<compile_context>
chip_gen: v7x
topology: tpu7x:2x2x1
jax: 0.10.0
libtpu: 0.0.40
codegen_flags: <defaults>
</compile_context>

<pallas_src>
import functools

import jax
import jax.numpy as jnp
from jax.experimental import pallas as pl
from jax.experimental.pallas import tpu as pltpu


def _round_up(n, m):
    return ((n + m - 1) // m) * m


def _encoder_kernel(x_ref, w1_ref, b1_ref, w2_ref, b2_ref, o_ref):
    # h = relu(x @ W1' + b1')   (eval-mode BatchNorm folded into W1'/b1')
    h = jnp.dot(x_ref[...], w1_ref[...], preferred_element_type=jnp.float32)
    h = jnp.maximum(h + b1_ref[...], 0.0)
    # Dropout: identity at inference (eval) time.
    # out = tanh(h @ W2^T + b2)
    out = jnp.dot(h, w2_ref[...], preferred_element_type=jnp.float32)
    o_ref[...] = jnp.tanh(out + b2_ref[...]).astype(o_ref.dtype)


@functools.partial(jax.jit, static_argnames=("tile_b",))
def enhanced_mlp_encoder(x, params, tile_b=1024):
    """Forward pass of EnhancedMLPEncoder (inference semantics).

    x: (B, D_in) float32.  Returns (latent, None) where latent is (B, D_lat).
    """
    w1, b1, gamma, beta, run_mean, run_var, w2, b2 = params
    eps = 1e-5

    B, d_in = x.shape
    hidden = w1.shape[0]          # 128
    d_lat = w2.shape[0]           # latent_dim

    # --- Fold eval-mode BatchNorm1d into the first linear (all f32) --------
    # bn(h) = (h - mean) * gamma / sqrt(var+eps) + beta = h*s + t
    # => relu-input = x @ (W1^T * s) + (b1*s + t)
    inv_std = jax.lax.rsqrt(run_var + eps)
    bn_scale = gamma * inv_std                       # (H,)
    bn_shift = beta - run_mean * bn_scale            # (H,)
    w1_t = w1.T * bn_scale[None, :]                  # (D_in, H)  f32
    b1_f = (b1 * bn_scale + bn_shift).reshape(1, hidden)
    w2_t = w2.T                                      # (H, D_lat) f32
    b2_r = b2.reshape(1, d_lat)

    # --- Batch tile: multiple of 8, >=2 grid steps for mid/large B ---------
    # (so v7x's two TensorCores both get work), capped at tile_b.
    tb = min(int(tile_b), _round_up(-(-B // 2), 8))
    tb = max(8, _round_up(tb, 8))
    grid = (pl.cdiv(B, tb),)      # ragged last block handled by Pallas

    out = pl.pallas_call(
        _encoder_kernel,
        out_shape=jax.ShapeDtypeStruct((B, d_lat), jnp.float32),
        grid_spec=pltpu.PrefetchScalarGridSpec(
            num_scalar_prefetch=0,
            grid=grid,
            in_specs=[
                pl.BlockSpec((tb, d_in), lambda i: (i, 0)),       # x tile (streamed)
                pl.BlockSpec((d_in, hidden), lambda i: (0, 0)),   # W1' (resident)
                pl.BlockSpec((1, hidden), lambda i: (0, 0)),      # b1'
                pl.BlockSpec((hidden, d_lat), lambda i: (0, 0)),  # W2^T
                pl.BlockSpec((1, d_lat), lambda i: (0, 0)),       # b2
            ],
            out_specs=pl.BlockSpec((tb, d_lat), lambda i: (i, 0)),
        ),
        compiler_params=pltpu.CompilerParams(
            dimension_semantics=("parallel",)),
    )(x, w1_t, b1_f, w2_t, b2_r)

    return out, None


def init_params(key, input_dim, latent_dim=64, hidden=128):
    """Deterministic synthetic parameters matching the PyTorch shapes."""
    k1, k2, k3, k4, k5, k6, k7 = jax.random.split(key, 7)
    # nn.Linear(input_dim, 128): weight (128, input_dim), bias (128,)
    lim1 = 1.0 / jnp.sqrt(input_dim)
    w1 = jax.random.uniform(k1, (hidden, input_dim), jnp.float32, -lim1, lim1)
    b1 = jax.random.uniform(k2, (hidden,), jnp.float32, -lim1, lim1)
    # nn.BatchNorm1d(128): gamma, beta, running_mean, running_var
    gamma = 1.0 + 0.1 * jax.random.normal(k3, (hidden,), jnp.float32)
    beta = 0.1 * jax.random.normal(k4, (hidden,), jnp.float32)
    run_mean = 0.05 * jax.random.normal(k5, (hidden,), jnp.float32)
    run_var = jnp.abs(1.0 + 0.1 * jax.random.normal(k6, (hidden,), jnp.float32))
    # nn.Linear(128, latent_dim): weight (latent_dim, 128), bias (latent_dim,)
    lim2 = 1.0 / jnp.sqrt(hidden)
    w2 = jax.random.uniform(k7, (latent_dim, hidden), jnp.float32, -lim2, lim2)
    b2 = jnp.zeros((latent_dim,), jnp.float32)
    return (w1, b1, gamma, beta, run_mean, run_var, w2, b2)


def _reference(x, params):
    """Pure-JAX f32 reference of the same forward pass (sanity check)."""
    w1, b1, gamma, beta, run_mean, run_var, w2, b2 = params
    eps = 1e-5
    h = x @ w1.T + b1
    h = (h - run_mean) / jnp.sqrt(run_var + eps) * gamma + beta
    h = jnp.maximum(h, 0.0)
    return jnp.tanh(h @ w2.T + b2)


if __name__ == "__main__":
    key = jax.random.PRNGKey(0)
    k_x, k_p = jax.random.split(key)

    batch, input_dim, latent_dim = 8, 32, 64
    x = jax.random.normal(k_x, (batch, input_dim), jnp.float32)
    params = init_params(k_p, input_dim, latent_dim)

    out, aux = enhanced_mlp_encoder(x, params)
    out = jax.block_until_ready(out)

    ref = _reference(x, params)
    assert out.shape == (batch, latent_dim)
    assert aux is None
    # Default TPU matmul precision may round f32 operands internally; keep a
    # modest tolerance vs the pure-f32 reference.
    assert jnp.allclose(out, ref, atol=2e-2, rtol=2e-2), "mismatch vs reference"

    # Exercise a ragged (non multiple-of-tile, non multiple-of-8) batch so the
    # padded-last-block / discarded-OOB-write path is covered.
    x2 = jax.random.normal(k_x, (13, input_dim), jnp.float32)
    out2, _ = enhanced_mlp_encoder(x2, params)
    out2 = jax.block_until_ready(out2)
    assert out2.shape == (13, latent_dim)
    assert jnp.allclose(out2, _reference(x2, params), atol=2e-2, rtol=2e-2)

    print("KERNEL_OK")
</pallas_src>

<mosaic_0001>
module attributes {stable_mosaic.version = 11 : i64} {
  func.func @_encoder_kernel(%arg0: i32, %arg1: memref<8x32xf32, #tpu.memory_space<vmem>>, %arg2: memref<32x128xf32, #tpu.memory_space<vmem>>, %arg3: memref<1x128xf32, #tpu.memory_space<vmem>>, %arg4: memref<128x64xf32, #tpu.memory_space<vmem>>, %arg5: memref<1x64xf32, #tpu.memory_space<vmem>>, %arg6: memref<8x64xf32, #tpu.memory_space<vmem>>) attributes {dimension_semantics = [#tpu.dimension_semantics<parallel>], iteration_bounds = array<i64: 1>, scalar_prefetch = 0 : i64, scratch_operands = 0 : i64, tpu.core_type = #tpu.core_type<tc>, window_params = [{transform_indices = @transform_0, window_bounds = array<i64: 8, 32>}, {pipeline_mode = #tpu.pipeline_mode<synchronous>, transform_indices = @transform_1, window_bounds = array<i64: 32, 128>}, {pipeline_mode = #tpu.pipeline_mode<synchronous>, transform_indices = @transform_2, window_bounds = array<i64: 1, 128>}, {pipeline_mode = #tpu.pipeline_mode<synchronous>, transform_indices = @transform_3, window_bounds = array<i64: 128, 64>}, {pipeline_mode = #tpu.pipeline_mode<synchronous>, transform_indices = @transform_4, window_bounds = array<i64: 1, 64>}, {transform_indices = @transform_5, window_bounds = array<i64: 8, 64>}]} {
    %c0 = arith.constant 0 : index
    %c0_0 = arith.constant 0 : index
    %0 = vector.load %arg1[%c0, %c0_0] : memref<8x32xf32, #tpu.memory_space<vmem>>, vector<8x32xf32>
    %c0_1 = arith.constant 0 : index
    %c0_2 = arith.constant 0 : index
    %1 = vector.load %arg2[%c0_1, %c0_2] : memref<32x128xf32, #tpu.memory_space<vmem>>, vector<32x128xf32>
    %cst = arith.constant dense<0.000000e+00> : vector<8x128xf32>
    %2 = tpu.matmul %0, %1, %cst {dimension_numbers = #tpu.dot_dimension_numbers<[1], [0], [0], [1], [0, 0, 1, 1], [], []>} : vector<8x32xf32>, vector<32x128xf32>, vector<8x128xf32> -> vector<8x128xf32>
    %c0_3 = arith.constant 0 : index
    %c0_4 = arith.constant 0 : index
    %3 = vector.load %arg3[%c0_3, %c0_4] : memref<1x128xf32, #tpu.memory_space<vmem>>, vector<1x128xf32>
    %4 = vector.broadcast %3 : vector<1x128xf32> to vector<8x128xf32>
    %5 = arith.addf %2, %4 : vector<8x128xf32>
    %cst_5 = arith.constant 0.000000e+00 : f32
    %6 = vector.broadcast %cst_5 : f32 to vector<8x128xf32>
    %7 = arith.maximumf %5, %6 : vector<8x128xf32>
    %c0_6 = arith.constant 0 : index
    %c0_7 = arith.constant 0 : index
    %8 = vector.load %arg4[%c0_6, %c0_7] : memref<128x64xf32, #tpu.memory_space<vmem>>, vector<128x64xf32>
    %cst_8 = arith.constant dense<0.000000e+00> : vector<8x64xf32>
    %9 = tpu.matmul %7, %8, %cst_8 {dimension_numbers = #tpu.dot_dimension_numbers<[1], [0], [0], [1], [0, 0, 1, 1], [], []>} : vector<8x128xf32>, vector<128x64xf32>, vector<8x64xf32> -> vector<8x64xf32>
    %c0_9 = arith.constant 0 : index
    %c0_10 = arith.constant 0 : index
    %10 = vector.load %arg5[%c0_9, %c0_10] : memref<1x64xf32, #tpu.memory_space<vmem>>, vector<1x64xf32>
    %11 = vector.broadcast %10 : vector<1x64xf32> to vector<8x64xf32>
    %12 = arith.addf %9, %11 : vector<8x64xf32>
    %13 = math.tanh %12 : vector<8x64xf32>
    %c0_11 = arith.constant 0 : index
    %c0_12 = arith.constant 0 : index
    %14 = vector.load %arg6[%c0_11, %c0_12] : memref<8x64xf32, #tpu.memory_space<vmem>>, vector<8x64xf32>
    tpu.vector_store %arg6[%c0_11, %c0_12], %13 {strides = array<i32>} : memref<8x64xf32, #tpu.memory_space<vmem>>, vector<8x64xf32>,
    return
  }
  func.func @transform_0(%arg0: i32) -> (i32, i32) {
    %c0_i32 = arith.constant 0 : i32
    %c0_i32_0 = arith.constant 0 : i32
    return %arg0, %c0_i32 : i32, i32
  }
  func.func @transform_1(%arg0: i32) -> (i32, i32) {
    %c0_i32 = arith.constant 0 : i32
    %c0_i32_0 = arith.constant 0 : i32
    %c0_i32_1 = arith.constant 0 : i32
    return %c0_i32, %c0_i32_0 : i32, i32
  }
  func.func @transform_2(%arg0: i32) -> (i32, i32) {
    %c0_i32 = arith.constant 0 : i32
    %c0_i32_0 = arith.constant 0 : i32
    %c0_i32_1 = arith.constant 0 : i32
    return %c0_i32, %c0_i32_0 : i32, i32
  }
  func.func @transform_3(%arg0: i32) -> (i32, i32) {
    %c0_i32 = arith.constant 0 : i32
    %c0_i32_0 = arith.constant 0 : i32
    %c0_i32_1 = arith.constant 0 : i32
    return %c0_i32, %c0_i32_0 : i32, i32
  }
  func.func @transform_4(%arg0: i32) -> (i32, i32) {
    %c0_i32 = arith.constant 0 : i32
    %c0_i32_0 = arith.constant 0 : i32
    %c0_i32_1 = arith.constant 0 : i32
    return %c0_i32, %c0_i32_0 : i32, i32
  }
  func.func @transform_5(%arg0: i32) -> (i32, i32) {
    %c0_i32 = arith.constant 0 : i32
    %c0_i32_0 = arith.constant 0 : i32
    return %arg0, %c0_i32 : i32, i32
  }
}

</mosaic_0001>

<bundles_post_ra>
// kernel: enhanced_mlp_encoder.1
= control target key start
LH: loop header
LB: loop body
LE: loop exit
PB: predicated region body
PF: predicated region fallthrough
CT: control target
= control target key end

     0   :  { %v349_v3 = vmov 0.0|0.0   ;;  %vm350_vm0 = vmmov 0   ;;  %v351_v6 = vmov 0.0   ;;  %s464_s0 = inlined_call_operand.vmem [shape: f32[8,32], index: 0, kind: input, shape index: {}]   ;;  %s465_s1 = inlined_call_operand.vmem [shape: f32[32,128], index: 1, kind: input, shape index: {}]   ;;  %s466_s2 = inlined_call_operand.vmem [shape: f32[1,128], index: 2, kind: input, shape index: {}]   ;;  %s467_s3 = inlined_call_operand.vmem [shape: f32[128,64], index: 3, kind: input, shape index: {}]   ;;  %s468_s4 = inlined_call_operand.vmem [shape: f32[1,64], index: 4, kind: input, shape index: {}]   ;;  %s469_s5 = inlined_call_operand.hbm [shape: f32[8,64], index: 5, kind: output, shape index: {}]  }
   0x1   :  { %v22_v0 = vld [vmem:[%s465_s1] sm:$0xff]  ;;  %v23_v1 = vld [vmem:[%s465_s1 + $0x8] sm:$0xff]  ;;  %v24_v2 = vld [vmem:[%s465_s1 + $0x10] sm:$0xff]  ;;  %289 = vmatprep.subr.bf16.mxu0 %v349_v3  ;;  %251 = vmatprep.mubr.msk.f32.mxu0 %vm350_vm0, %v351_v6 }
   0x2   :  { %v290_v4 = vpack.c.bf16 %v23_v1, %v22_v0  ;;  %v25_v5 = vld [vmem:[%s465_s1 + $0x18] sm:$0xff]  ;;  %v108_v7 = vld [vmem:[%s467_s3] sm:$0xff]  ;;  %295 = vmatprep.subr.bf16.mxu1 %v349_v3  ;;  %v109_v8 = vld [vmem:[%s467_s3 + $0x8] sm:$0xff]  ;;  %286 = vmatprep.mubr.msk.f32.mxu1 %vm350_vm0, %v351_v6 }
   0x3   :  { %v110_v9 = vld [vmem:[%s467_s3 + $0x10] sm:$0xff]  ;;  %v111_v10 = vld [vmem:[%s467_s3 + $0x18] sm:$0xff]  ;;  %v293_v11 = vpack.c.bf16 %v25_v5, %v24_v2  ;;  %v296_v12 = vpack.c.bf16 %v109_v8, %v108_v7  ;;  %v112_v14 = vld [vmem:[%s467_s3 + $0x20] sm:$0xff] }
   0x4   :  { %291 = vmatpush3.bf16.msra.mxu0 %v290_v4  ;;  %v299_v13 = vpack.c.bf16 %v111_v10, %v110_v9  ;;  %v113_v15 = vld [vmem:[%s467_s3 + $0x28] sm:$0xff] }
   0x5   :  { %292 = vmatprep.subr.bf16.mxu0 %v349_v3  ;;  %297 = vmatpush3.bf16.msra.mxu1 %v296_v12 }
   0x6   :  { %298 = vmatprep.subr.bf16.mxu1 %v349_v3 }
   0x7   :  { %10 = vsyncpa [#allocation3], 0  ;;  %v21_v16 = vld [vmem:[%s464_s0] sm:$0xff]  ;;  %vm33_vm1 = vcmask 261120   ;;  %v302_v17 = vpack.c.bf16 %v113_v15, %v112_v14  ;;  %v114_v18 = vld [vmem:[%s467_s3 + $0x30] sm:$0xff]  ;;  %vm202_vm2 = vcmask 523264  }
   0x8   :  { %294 = vmatpush3.bf16.msra.mxu0 %v293_v11  ;;  %v115_v19 = vld [vmem:[%s467_s3 + $0x38] sm:$0xff]  ;;  %v116_v21 = vld [vmem:[%s467_s3 + $0x40] sm:$0xff]  ;;  %v117_v22 = vld [vmem:[%s467_s3 + $0x48] sm:$0xff] }
   0x9   :  { %300 = vmatpush3.bf16.msra.mxu1 %v299_v13  ;;  %v305_v20 = vpack.c.bf16 %v115_v19, %v114_v18  ;;  %v308_v23 = vpack.c.bf16 %v117_v22, %v116_v21  ;;  %v118_v24 = vld [vmem:[%s467_s3 + $0x50] sm:$0xff]  ;;  %v119_v25 = vld [vmem:[%s467_s3 + $0x58] sm:$0xff]  ;;  %v120_v27 = vld [vmem:[%s467_s3 + $0x60] sm:$0xff] }
   0xa   :  { %301 = vmatprep.subr.bf16.mxu1 %v349_v3  ;;  %v311_v26 = vpack.c.bf16 %v119_v25, %v118_v24  ;;  %v121_v28 = vld [vmem:[%s467_s3 + $0x68] sm:$0xff]  ;;  %v122_v30 = vld [vmem:[%s467_s3 + $0x70] sm:$0xff]  ;;  %v123_v31 = vld [vmem:[%s467_s3 + $0x78] sm:$0xff]  ;;  %s352_s3 = smov [#allocation2]  }
   0xb   :  { %252 = vmatmul.mubr.msk.f32.vlgmr.msra.gmra.mrb[0].mxu0 %vm33_vm1, %v21_v16  ;;  %v314_v29 = vpack.c.bf16 %v121_v28, %v120_v27  ;;  %v317_v32 = vpack.c.bf16 %v123_v31, %v122_v30  ;;  %v218_v33 = vld [vmem:[%s466_s2] ss:$0 sm:$0xff]  ;;  %s210_s11 = sshll.u32 %s352_s3, 4  ;;  %s211_s11 = int_to_ptr.vmem [resolvable:$true] %s210_s11 }
   0xc   :  { %v220_v38 = vld [vmem:[%s468_s4] ss:$0 sm:$0xff]  ;;  %s325_s2 = scalar_lea.vmem %s211_s11, 128  ;;  %p330_p1 = scmp.lt.s32.totalorder %s211_s11, %s211_s11 }
   0xd   :  { %303 = vmatpush3.bf16.msra.mxu1 %v302_v17  ;;  %p326_p0 = scmp.ne.s32.totalorder %s211_s11, %s325_s2  ;;  %p331_p2 = scmp.lt.s32.totalorder %s325_s2, %s325_s2 }
   0xe   :  { %304 = vmatprep.subr.bf16.mxu1 %v349_v3 }
   0xf   :  { %p332_p3 = por %p331_p2, %p330_p1 }
  0x11   :  { %306 = vmatpush3.bf16.msra.mxu1 %v305_v20  ;;  %p333_p4 = pnand %p332_p3, %p326_p0 }
  0x12   :  { %307 = vmatprep.subr.bf16.mxu1 %v349_v3 }
  0x15   :  { %309 = vmatpush3.bf16.msra.mxu1 %v308_v23 }
  0x16   :  { %310 = vmatprep.subr.bf16.mxu1 %v349_v3 }
  0x19   :  { %312 = vmatpush3.bf16.msra.mxu1 %v311_v26 }
  0x1a   :  { %313 = vmatprep.subr.bf16.mxu1 %v349_v3 }
  0x1d   :  { %315 = vmatpush3.bf16.msra.mxu1 %v314_v29 }
  0x1e   :  { %316 = vmatprep.subr.bf16.mxu1 %v349_v3 }
  0x21   :  { %318 = vmatpush3.bf16.msra.mxu1 %v317_v32 }
  0xde   :  { %v103_v34 = vpop.f32.mrb[0].mxu0 }
  0xdf   :  { %v104_v35 = vadd.f32 %v218_v33, %v103_v34  ;;  %v253_v36 = vpop.f32.mrb[1].mxu0 }
  0xe1   :  { %v107_v37 = vmax.f32 %v104_v35, 0.0 }
  0xe3   :  { %287 = vmatmul.mubr.f32.vlgmr.msra.gmra.mrb[0].mxu1 %v107_v37 }
 0x1b6   :  { %v197_v39 = vpop.f32.mrb[0].mxu1 }
 0x1b7   :  { %v198_v40 = vadd.f32 %v220_v38, %v197_v39  ;;  %v288_v41 = vpop.f32.mrb[1].mxu1 }
 0x1b9   :  { %323 = vtanh.f32 %v198_v40 }
 0x1c3   :  { %v324_v42 = vpop.eup %323 }
 0x1c4   :  { %203 = vst.msk [vmem:[#allocation2] sm:$0xff] %vm202_vm2, %v324_v42 }
 0x1c5   :  { %336 = shalt.err (!%p333_p4)
}
 0x1c6   :  { %s337_s4 = scalar_lea.hbm %s469_s5, 128 }
 0x1c7   :  { %p338_p5 = scmp.ne.s32.totalorder %s469_s5, %s337_s4  ;;  %p341_p6 = scmp.lt.u32.totalorder %s337_s4, %s469_s5 }
 0x1c9   :  { %p343_p7 = pnand %p341_p6, %p338_p5 }
 0x1cb   :  { %346 = shalt.err (!%p343_p7)
}
 0x1cc   :  { %213 = dma.vmem_to_hbm [thread:$0]  %s211_s11, 128, %s469_s5, [#allocation3]  }
 0x1cd   :  { %347 = dma.done.wait [#allocation3], 128  }
 0x1ce   :  { %348 = vsyncadd [#allocation3], 4294967168 }
 0x1cf   :  { %217 = vsyncpa [#allocation3], 1 }

</bundles_post_ra>
